<compile_context>
chip_gen: v6e
topology: v6e:2x2x1
jax: 0.10.0
libtpu: 0.0.40
codegen_flags: <defaults>
</compile_context>

<pallas_src>
import functools

import jax
import jax.numpy as jnp
from jax.experimental import pallas as pl
from jax.experimental.pallas import tpu as pltpu

_HID = 10     # hidden width of the MLP
_OUT = 2      # output width
_WSLOTS = 5   # packed weight slots


def _round_up(x, m):
    return ((x + m - 1) // m) * m


def _pad_lanes(x, n):
    pad = n - x.shape[-1]
    if pad > 0:
        x = jnp.pad(x, ((0, 0), (0, pad)))
    return x


def _g_gaussian_kernel(zt_ref, lbl_ref, wp_ref, o_ref, *, num_classes):
    """Feature-major MLP tile (batch on the 128-lane axis).

    zt_ref : (nz, TB)            z, feature-major (compute_dtype)
    lbl_ref: (1, TB)             int32 class labels
    wp_ref : (5, HID, 128) f32   resident packed weights (single DMA):
             [0] w1z (HID, nz)   [1] w2 (HID, HID)
             [2] w34 (HID, HID)  rows >= OUT are zero (w4 @ w3 padded)
             [3] class_bias.T (HID, C) = (embed @ w1e.T + b1).T
             [4] lane0 = b2 (HID), lane1 rows[:OUT] = b34 = w4 @ b3 + b4
    o_ref  : (OUT, TB)           lane-dense output tile
    """
    nz = zt_ref.shape[0]
    tb = zt_ref.shape[1]
    f32 = jnp.float32

    w1z = wp_ref[0, :, :nz]                 # (HID, nz)
    w2 = wp_ref[1, :, :_HID]                # (HID, HID)
    w34 = wp_ref[2, :, :_HID]               # (HID, HID), rows >= OUT are zero
    cbT = wp_ref[3, :, :num_classes]        # (HID, C)
    b2 = wp_ref[4, :, 0:1]                  # (HID, 1)
    b34 = wp_ref[4, :, 1:2]                 # (HID, 1), rows >= OUT are zero

    zt = zt_ref[...].astype(f32)            # (nz, TB)  f32 accumulation path
    lbl = lbl_ref[...]                      # (1, TB)   int32

    # One-hot(label) built from iota + compare; selects the per-class column
    # of the folded first-layer bias table via a tiny MXU matmul.
    iota_c = jax.lax.broadcasted_iota(jnp.int32, (num_classes, tb), 0)
    onehot = (iota_c == lbl).astype(f32)    # (C, TB)

    # Layer 1: Linear(2*nz, 10) -> Tanh  (embed(label) @ w1e.T + b1 folded
    # into the class-bias table selected by the one-hot).
    h = jnp.dot(w1z, zt, preferred_element_type=f32)
    h = h + jnp.dot(cbT, onehot, preferred_element_type=f32)
    h = jnp.tanh(h)                                              # (HID, TB) f32
    # Layer 2: Linear(10, 10) -> Tanh
    h = jnp.tanh(jnp.dot(w2, h, preferred_element_type=f32) + b2)
    # Layers 3 + 4 folded (no activation between them): exact.
    out = jnp.dot(w34, h, preferred_element_type=f32) + b34      # (HID, TB), rows >= OUT garbage

    o_ref[...] = out[:_OUT, :].astype(o_ref.dtype)


def _pick_tile(batch, tb_max):
    """Batch tile (multiple of 128) + padded batch; >=2 grid steps when possible."""
    tb_max = max(128, (int(tb_max) // 128) * 128)
    b128 = _round_up(max(batch, 1), 128)
    if b128 >= 256:
        tb = min(tb_max, _round_up(-(-b128 // 2), 128))   # at least 2 steps (megacore)
    else:
        tb = b128
    b_pad = _round_up(b128, tb)
    return tb, b_pad


def g_gaussian_forward(z, label, params, *, compute_dtype=jnp.float32, tb_max=32768):
    """Forward pass of G_guassian.

    z:      (B, nz)  float32
    label:  (B,)     integer class ids
    params: PyTorch-layout tensors: embed (C, nz), w1 (10, 2*nz), b1 (10,),
            w2/w3 (10,10), b2/b3 (10,), w4 (2,10), b4 (2,)
    compute_dtype: dtype used to stream z (f32 or bf16); accumulation and all
                   VPU/EUP math stay f32 (v5e-safe).
    """
    B, nz = z.shape
    embed = params["embed"]
    num_classes = embed.shape[0]
    w1, b1 = params["w1"], params["b1"]
    w2, b2 = params["w2"], params["b2"]
    w3, b3 = params["w3"], params["b3"]
    w4, b4 = params["w4"], params["b4"]

    # ---- Fold embedding + first-layer bias into a (C, 10) class table ----
    w1_z = w1[:, :nz]                                   # acts on z
    w1_e = w1[:, nz:]                                   # acts on embed(label)
    class_bias = embed @ w1_e.T + b1[None, :]           # (C, HID), f32

    # ---- Fold layers 3 and 4 (exact: no activation between them) ----
    w34 = w4 @ w3                                       # (OUT, HID)
    b34 = w4 @ b3 + b4                                  # (OUT,)

    # ---- Tile selection (lane-dense batch axis) ----
    tb, b_pad = _pick_tile(B, tb_max)

    # ---- Feature-major streamed inputs ----
    zt = _pad_lanes(z.T, b_pad).astype(compute_dtype)                    # (nz, b_pad)
    lblp = _pad_lanes(label.reshape(1, B).astype(jnp.int32), b_pad)      # (1,  b_pad)

    # ---- Pack all resident weights/biases into one (5, HID, 128) f32 blob ----
    wpack = jnp.zeros((_WSLOTS, _HID, 128), jnp.float32)
    wpack = wpack.at[0, :, :nz].set(w1_z)
    wpack = wpack.at[1, :, :_HID].set(w2)
    wpack = wpack.at[2, :_OUT, :_HID].set(w34)
    wpack = wpack.at[3, :, :num_classes].set(class_bias.T)
    wpack = wpack.at[4, :, 0].set(b2)
    wpack = wpack.at[4, :_OUT, 1].set(b34)

    itm_z = jnp.dtype(compute_dtype).itemsize
    cost = pl.CostEstimate(
        flops=2 * b_pad * (_HID * nz + _HID * num_classes + _HID * _HID + _OUT * _HID),
        transcendentals=2 * b_pad * _HID,
        bytes_accessed=(zt.size * itm_z + lblp.size * 4 + wpack.size * 4
                        + _OUT * b_pad * 4),
    )

    kernel = functools.partial(_g_gaussian_kernel, num_classes=num_classes)

    out_t = pl.pallas_call(
        kernel,
        out_shape=jax.ShapeDtypeStruct((_OUT, b_pad), jnp.float32),
        grid=(b_pad // tb,),
        in_specs=[
            pl.BlockSpec((nz, tb), lambda i: (0, i)),               # z, blocked over batch
            pl.BlockSpec((1, tb), lambda i: (0, i)),                # labels, lane-dense
            pl.BlockSpec((_WSLOTS, _HID, 128), lambda i: (0, 0, 0)),  # resident weights
        ],
        out_specs=pl.BlockSpec((_OUT, tb), lambda i: (0, i)),        # lane-dense output
        compiler_params=pltpu.CompilerParams(
            dimension_semantics=("parallel",)),                      # megacore on v7x
        cost_estimate=cost,
    )(zt, lblp, wpack)

    return out_t[:, :B].T                                            # (B, 2)


def init_params(key, nz, num_classes=2):
    """Deterministic synthetic parameters in PyTorch (out, in) layout."""
    ks = jax.random.split(key, 9)
    s = 0.1
    return {
        "embed": jax.random.normal(ks[0], (num_classes, nz), jnp.float32) * s,
        "w1": jax.random.normal(ks[1], (_HID, 2 * nz), jnp.float32) * s,
        "b1": jax.random.normal(ks[2], (_HID,), jnp.float32) * s,
        "w2": jax.random.normal(ks[3], (_HID, _HID), jnp.float32) * s,
        "b2": jax.random.normal(ks[4], (_HID,), jnp.float32) * s,
        "w3": jax.random.normal(ks[5], (_HID, _HID), jnp.float32) * s,
        "b3": jax.random.normal(ks[6], (_HID,), jnp.float32) * s,
        "w4": jax.random.normal(ks[7], (_OUT, _HID), jnp.float32) * s,
        "b4": jax.random.normal(ks[8], (_OUT,), jnp.float32) * s,
    }


def _reference_forward(z, label, params):
    """Pure-JAX reference (PyTorch layout: y = x @ W.T + b)."""
    e = jnp.take(params["embed"], label, axis=0)
    x = jnp.concatenate([z, e], axis=1)
    h = jnp.tanh(x @ params["w1"].T + params["b1"])
    h = jnp.tanh(h @ params["w2"].T + params["b2"])
    h = h @ params["w3"].T + params["b3"]
    return h @ params["w4"].T + params["b4"]


if __name__ == "__main__":
    key = jax.random.PRNGKey(0)
    k_param, k_z, k_lbl, k_z2, k_lbl2 = jax.random.split(key, 5)

    B, nz, num_classes = 8, 4, 2
    params = init_params(k_param, nz, num_classes)

    z = jax.random.normal(k_z, (B, nz), jnp.float32)
    label = jax.random.randint(k_lbl, (B,), 0, num_classes, jnp.int32)
    ref = _reference_forward(z, label, params)

    # f32 path: near-exact match vs reference (single grid step).
    out = jax.block_until_ready(g_gaussian_forward(z, label, params))
    assert out.shape == (B, _OUT), out.shape
    assert jnp.allclose(out, ref, atol=1e-5, rtol=1e-5), "f32 mismatch vs reference"

    # bf16-streaming path (f32 accumulation / f32 weights): loose tolerance.
    out_bf16 = jax.block_until_ready(
        g_gaussian_forward(z, label, params, compute_dtype=jnp.bfloat16))
    assert out_bf16.shape == (B, _OUT), out_bf16.shape
    assert jnp.allclose(out_bf16, ref, atol=3e-2, rtol=5e-2), "bf16 mismatch vs reference"

    # Multi-tile path (exercises grid > 1, batch-lane padding, megacore split).
    B2 = 300
    z2 = jax.random.normal(k_z2, (B2, nz), jnp.float32)
    label2 = jax.random.randint(k_lbl2, (B2,), 0, num_classes, jnp.int32)
    ref2 = _reference_forward(z2, label2, params)
    out2 = jax.block_until_ready(g_gaussian_forward(z2, label2, params))
    assert out2.shape == (B2, _OUT), out2.shape
    assert jnp.allclose(out2, ref2, atol=1e-5, rtol=1e-5), "multi-tile mismatch vs reference"

    print("KERNEL_OK")
</pallas_src>

<mosaic_0001>
module attributes {stable_mosaic.version = 11 : i64} {
  func.func @_g_gaussian_kernel(%arg0: i32, %arg1: memref<4x128xf32, #tpu.memory_space<vmem>>, %arg2: memref<1x128xi32, #tpu.memory_space<vmem>>, %arg3: memref<5x10x128xf32, #tpu.memory_space<vmem>>, %arg4: memref<2x128xf32, #tpu.memory_space<vmem>>) attributes {dimension_semantics = [#tpu.dimension_semantics<parallel>], iteration_bounds = array<i64: 1>, scalar_prefetch = 0 : i64, scratch_operands = 0 : i64, tpu.core_type = #tpu.core_type<tc>, window_params = [{transform_indices = @transform_0, window_bounds = array<i64: 4, 128>}, {transform_indices = @transform_1, window_bounds = array<i64: 1, 128>}, {pipeline_mode = #tpu.pipeline_mode<synchronous>, transform_indices = @transform_2, window_bounds = array<i64: 5, 10, 128>}, {transform_indices = @transform_3, window_bounds = array<i64: 2, 128>}]} {
    %c0 = arith.constant 0 : index
    %c0_0 = arith.constant 0 : index
    %c0_1 = arith.constant 0 : index
    %0 = vector.load %arg3[%c0, %c0_0, %c0_1] : memref<5x10x128xf32, #tpu.memory_space<vmem>>, vector<1x10x4xf32>
    %1 = vector.shape_cast %0 : vector<1x10x4xf32> to vector<10x4xf32>
    %c1 = arith.constant 1 : index
    %c0_2 = arith.constant 0 : index
    %c0_3 = arith.constant 0 : index
    %2 = vector.load %arg3[%c1, %c0_2, %c0_3] : memref<5x10x128xf32, #tpu.memory_space<vmem>>, vector<1x10x10xf32>
    %3 = vector.shape_cast %2 : vector<1x10x10xf32> to vector<10x10xf32>
    %c2 = arith.constant 2 : index
    %c0_4 = arith.constant 0 : index
    %c0_5 = arith.constant 0 : index
    %4 = vector.load %arg3[%c2, %c0_4, %c0_5] : memref<5x10x128xf32, #tpu.memory_space<vmem>>, vector<1x10x10xf32>
    %5 = vector.shape_cast %4 : vector<1x10x10xf32> to vector<10x10xf32>
    %c3 = arith.constant 3 : index
    %c0_6 = arith.constant 0 : index
    %c0_7 = arith.constant 0 : index
    %6 = vector.load %arg3[%c3, %c0_6, %c0_7] : memref<5x10x128xf32, #tpu.memory_space<vmem>>, vector<1x10x2xf32>
    %7 = vector.shape_cast %6 : vector<1x10x2xf32> to vector<10x2xf32>
    %c4 = arith.constant 4 : index
    %c0_8 = arith.constant 0 : index
    %c0_9 = arith.constant 0 : index
    %8 = vector.load %arg3[%c4, %c0_8, %c0_9] : memref<5x10x128xf32, #tpu.memory_space<vmem>>, vector<1x10x1xf32>
    %9 = vector.shape_cast %8 : vector<1x10x1xf32> to vector<10x1xf32>
    %c4_10 = arith.constant 4 : index
    %c0_11 = arith.constant 0 : index
    %c1_12 = arith.constant 1 : index
    %10 = vector.load %arg3[%c4_10, %c0_11, %c1_12] : memref<5x10x128xf32, #tpu.memory_space<vmem>>, vector<1x10x1xf32>
    %11 = vector.shape_cast %10 : vector<1x10x1xf32> to vector<10x1xf32>
    %c0_13 = arith.constant 0 : index
    %c0_14 = arith.constant 0 : index
    %12 = vector.load %arg1[%c0_13, %c0_14] : memref<4x128xf32, #tpu.memory_space<vmem>>, vector<4x128xf32>
    %c0_15 = arith.constant 0 : index
    %c0_16 = arith.constant 0 : index
    %13 = vector.load %arg2[%c0_15, %c0_16] : memref<1x128xi32, #tpu.memory_space<vmem>>, vector<1x128xi32>
    %14 = tpu.iota {dimensions = array<i32: 0>} : vector<2x128xi32>
    %15 = vector.broadcast %13 : vector<1x128xi32> to vector<2x128xi32>
    %16 = arith.cmpi eq, %14, %15 : vector<2x128xi32>
    %17 = arith.extui %16 : vector<2x128xi1> to vector<2x128xi32>
    %18 = arith.sitofp %17 : vector<2x128xi32> to vector<2x128xf32>
    %cst = arith.constant dense<0.000000e+00> : vector<10x128xf32>
    %19 = tpu.matmul %1, %12, %cst {dimension_numbers = #tpu.dot_dimension_numbers<[1], [0], [0], [1], [0, 0, 1, 1], [], []>} : vector<10x4xf32>, vector<4x128xf32>, vector<10x128xf32> -> vector<10x128xf32>
    %cst_17 = arith.constant dense<0.000000e+00> : vector<10x128xf32>
    %20 = tpu.matmul %7, %18, %cst_17 {dimension_numbers = #tpu.dot_dimension_numbers<[1], [0], [0], [1], [0, 0, 1, 1], [], []>} : vector<10x2xf32>, vector<2x128xf32>, vector<10x128xf32> -> vector<10x128xf32>
    %21 = arith.addf %19, %20 : vector<10x128xf32>
    %22 = math.tanh %21 : vector<10x128xf32>
    %cst_18 = arith.constant dense<0.000000e+00> : vector<10x128xf32>
    %23 = tpu.matmul %3, %22, %cst_18 {dimension_numbers = #tpu.dot_dimension_numbers<[1], [0], [0], [1], [0, 0, 1, 1], [], []>} : vector<10x10xf32>, vector<10x128xf32>, vector<10x128xf32> -> vector<10x128xf32>
    %24 = vector.broadcast %9 : vector<10x1xf32> to vector<10x128xf32>
    %25 = arith.addf %23, %24 : vector<10x128xf32>
    %26 = math.tanh %25 : vector<10x128xf32>
    %cst_19 = arith.constant dense<0.000000e+00> : vector<10x128xf32>
    %27 = tpu.matmul %5, %26, %cst_19 {dimension_numbers = #tpu.dot_dimension_numbers<[1], [0], [0], [1], [0, 0, 1, 1], [], []>} : vector<10x10xf32>, vector<10x128xf32>, vector<10x128xf32> -> vector<10x128xf32>
    %28 = vector.broadcast %11 : vector<10x1xf32> to vector<10x128xf32>
    %29 = arith.addf %27, %28 : vector<10x128xf32>
    %30 = vector.extract_strided_slice %29 {offsets = [0, 0], sizes = [2, 128], strides = [1, 1]} : vector<10x128xf32> to vector<2x128xf32>
    %c0_20 = arith.constant 0 : index
    %c0_21 = arith.constant 0 : index
    %31 = vector.load %arg4[%c0_20, %c0_21] : memref<2x128xf32, #tpu.memory_space<vmem>>, vector<2x128xf32>
    tpu.vector_store %arg4[%c0_20, %c0_21], %30 {strides = array<i32>} : memref<2x128xf32, #tpu.memory_space<vmem>>, vector<2x128xf32>,
    return
  }
  func.func @transform_0(%arg0: i32) -> (i32, i32) {
    %c0_i32 = arith.constant 0 : i32
    %c0_i32_0 = arith.constant 0 : i32
    return %c0_i32, %arg0 : i32, i32
  }
  func.func @transform_1(%arg0: i32) -> (i32, i32) {
    %c0_i32 = arith.constant 0 : i32
    %c0_i32_0 = arith.constant 0 : i32
    return %c0_i32, %arg0 : i32, i32
  }
  func.func @transform_2(%arg0: i32) -> (i32, i32, i32) {
    %c0_i32 = arith.constant 0 : i32
    %c0_i32_0 = arith.constant 0 : i32
    %c0_i32_1 = arith.constant 0 : i32
    %c0_i32_2 = arith.constant 0 : i32
    return %c0_i32, %c0_i32_0, %c0_i32_1 : i32, i32, i32
  }
  func.func @transform_3(%arg0: i32) -> (i32, i32) {
    %c0_i32 = arith.constant 0 : i32
    %c0_i32_0 = arith.constant 0 : i32
    return %c0_i32, %arg0 : i32, i32
  }
}

</mosaic_0001>

<bundles_post_ra>
// kernel: tpu_custom_call.1
= control target key start
LH: loop header
LB: loop body
LE: loop exit
PB: predicated region body
PF: predicated region fallthrough
CT: control target
= control target key end

     0   :  { %8 = vsyncpa [#allocation3], 0  ;;  %s635_s0 = inlined_call_operand.hbm [shape: f32[4,128], index: 0, kind: input, shape index: {}]   ;;  %s636_s1 = inlined_call_operand.vmem [shape: s32[1,128], index: 1, kind: input, shape index: {}]   ;;  %s637_s2 = inlined_call_operand.hbm [shape: f32[5,10,128], index: 2, kind: input, shape index: {}]   ;;  %s638_s3 = inlined_call_operand.hbm [shape: f32[2,128], index: 3, kind: output, shape index: {}]  }
   0x1   :  { %9 = vsyncpa [#allocation6], 0 }
   0x2   :  { %10 = vsyncpa [#allocation4], 0  ;;  %s581_s12 = smov [#allocation2]   ;;  %s582_s14 = smov [#allocation5]  }
   0x3   :  { %s17_s13 = sshll.u32 %s581_s12, 4  ;;  %s28_s15 = sshll.u32 %s582_s14, 4  ;;  %s18_s13 = int_to_ptr.vmem [resolvable:$true] %s17_s13  ;;  %s29_s15 = int_to_ptr.vmem [resolvable:$true] %s28_s15 }
   0x4   :  { %s523_s16 = scalar_lea.vmem %s18_s13, 64  ;;  %p528_p1 = scmp.lt.s32.totalorder %s18_s13, %s18_s13 }
   0x5   :  { %p524_p0 = scmp.ne.s32.totalorder %s18_s13, %s523_s16  ;;  %p529_p2 = scmp.lt.s32.totalorder %s523_s16, %s523_s16 }
   0x7   :  { %p530_p3 = por %p529_p2, %p528_p1 }
   0x9   :  { %p531_p4 = pnand %p530_p3, %p524_p0 }
   0xb   :  { %534 = shalt.err (!%p531_p4)
}
   0xc   :  { %20 = dma.hbm_to_vmem [thread:$0]  %s635_s0, 64, %s18_s13, [#allocation3]  }
   0xd   :  { %s543_s19 = scalar_lea.vmem %s29_s15, 1280  ;;  %p548_p6 = scmp.lt.s32.totalorder %s29_s15, %s29_s15 }
   0xe   :  { %p544_p5 = scmp.ne.s32.totalorder %s29_s15, %s543_s19  ;;  %p549_p7 = scmp.lt.s32.totalorder %s543_s19, %s543_s19 }
  0x10   :  { %p550_p8 = por %p549_p7, %p548_p6 }
  0x12   :  { %p551_p9 = pnand %p550_p8, %p544_p5 }
  0x14   :  { %554 = shalt.err (!%p551_p9)
}
  0x15   :  { %s583_s20 = smov 128   ;;  %s584_s21 = smov 8  }
  0x16   :  { %34 = dma.hbm_to_vmem [thread:$0]  %s637_s2, 1280, %s29_s15, [#allocation6], %s583_s20, %s583_s20, %s584_s21  }
  0x17   :  { %575 = dma.done.wait [#allocation3], 64  }
  0x18   :  { %576 = vsyncadd [#allocation3], 4294967232 }
  0x19   :  { %577 = dma.done.wait [#allocation6], 1280  }
  0x1a   :  { %578 = vsyncadd [#allocation6], 4294966016  ;;  %v57_v0 = vlaneseq  ;;  %vm159_vm0 = vcmask 1043456   ;;  %vm152_vm1 = vcmask 31744   ;;  %vm66_vm2 = vcmask 15360   ;;  %v41_v3 = vld [vmem:[#allocation5] sm:$0xff] }
  0x1b   :  { %v55_v2 = vld [vmem:[#allocation2] sm:$0xf]  ;;  %vm73_vm3 = vcmask 1041408   ;;  %479 = vmatprep.mubr.msk.f32.mxu1 %vm152_vm1, %v41_v3  ;;  %v42_v5 = vld [vmem:[#allocation5 + $0x8] sm:$0x3]  ;;  %v50_v6 = vld [vmem:[#allocation5 + $0x30] sm:$0xff] }
  0x1c   :  { %v58_v1 = vshrl.u32 %v57_v0, 7  ;;  %v444_v4 = vld [vmem:[%s636_s1] ss:$0 sm:$0xff]  ;;  %477 = vmatprep.subr.msk.mxu1 %vm159_vm0, %v55_v2  ;;  %v585_v7 = vmov 0.0   ;;  %474 = vmatprep.mubr.msk.f32.mxu0 %vm66_vm2, %v50_v6  ;;  %v51_v9 = vld [vmem:[#allocation5 + $0x38] sm:$0x3] }
  0x1d   :  { %478 = vmatpush3.msk.msra.mxu1 %vm159_vm0, %v55_v2  ;;  %v44_v10 = vld [vmem:[#allocation5 + $0x10] sm:$0xff]  ;;  %vm250_vm5 = vcmask 80896   ;;  %v54_v11 = vld [vmem:[#allocation5 + $0x48] sm:$0x3]  ;;  %v586_v12 = vmov 0   ;;  %v53_v13 = vld [vmem:[#allocation5 + $0x40] sm:$0xff] }
  0x1e   :  { %vm63_vm4 = vcmp.eq.s32.totalorder %v58_v1, %v444_v4  ;;  %480 = vmatmul.mubr.msk.f32.vlgmr.msra.gmra.mxu1 %vm152_vm1, %v42_v5  ;;  %504 = vset.pattern.permute.xlu0 %v586_v12  ;;  %v45_v22 = vld [vmem:[#allocation5 + $0x18] sm:$0x3]  ;;  %v47_v23 = vld [vmem:[#allocation5 + $0x20] sm:$0xff]  ;;  %v587_v24 = vmov 1   ;;  %v48_v33 = vld [vmem:[#allocation5 + $0x28] sm:$0x3] }
  0x1f   :  { %v445_v8 = vsel %vm63_vm4, 1.0, %v585_v7  ;;  %247 = vperm.xlu0 %504, %v54_v11   ;;  %493 = vmatprep.mubr.msk.f32.mxu1 %vm250_vm5, %v47_v23  ;;  %s588_s1 = smov [#allocation7]  }
  0x20   :  { %472 = vmatprep.subr.msk.mxu0 %vm73_vm3, %v445_v8  ;;  %505 = vset.pattern.permute.xlu1 %v587_v24  ;;  %s434_s2 = sshll.u32 %s588_s1, 4  ;;  %s435_s2 = int_to_ptr.vmem [resolvable:$true] %s434_s2 }
  0x21   :  { %473 = vmatpush3.msk.msra.mxu0 %vm73_vm3, %v445_v8  ;;  %338 = vperm.xlu1 %505, %v53_v13   ;;  %s555_s25 = scalar_lea.vmem %s435_s2, 32  ;;  %p560_p11 = scmp.lt.s32.totalorder %s435_s2, %s435_s2 }
  0x22   :  { %475 = vmatmul.mubr.msk.f32.vlgmr.msra.gmra.mxu0 %vm66_vm2, %v51_v9  ;;  %p556_p10 = scmp.ne.s32.totalorder %s435_s2, %s555_s25  ;;  %p561_p12 = scmp.lt.s32.totalorder %s555_s25, %s555_s25 }
  0x23   :  { %486 = vmatprep.mubr.msk.f32.mxu0 %vm250_vm5, %v44_v10  ;;  %242 = vperm.xlu0 %504, %v53_v13  }
  0x24   :  { %p562_p13 = por %p561_p12, %p560_p11 }
  0x26   :  { %p563_p0 = pnand %p562_p13, %p556_p10 }
  0x27   :  { %506 = vset.pattern.permute.xlu0 %v587_v24 }
  0x9a   :  { %v248_v25 = vpop.permute.xlu0 %247 }
  0x9c   :  { %v339_v35 = vpop.permute.xlu1 %338 }
  0x9e   :  { %v243_v28 = vpop.permute.xlu0 %242 }
  0xde   :  { %v481_v14 = vpop.f32.mrf.mxu1 }
  0xe0   :  { %v229_v17 = vpop.f32.mrf.mxu1 }
  0xe2   :  { %v476_v15 = vpop.f32.mrf.mxu0 }
  0xe3   :  { %v235_v16 = vadd.f32 %v481_v14, %v476_v15 }
  0xe4   :  { %v143_v18 = vpop.f32.mrf.mxu0 }
  0xe5   :  { %507 = vtanh.f32 %v235_v16  ;;  %v230_v19 = vadd.f32 %v229_v17, %v143_v18 }
  0xe7   :  { %509 = vtanh.f32 %v230_v19 }
  0xf2   :  { %v508_v20 = vpop.eup %507 }
  0xf3   :  { %482 = vmatprep.subr.msk.mxu0 %vm73_vm3, %v508_v20 }
  0xf4   :  { %v510_v21 = vpop.eup %509  ;;  %483 = vmatpush3.msk.msra.mxu0 %vm73_vm3, %v508_v20 }
  0xf5   :  { %484 = vmatprep.subr.mxu0 %v510_v21 }
  0xf6   :  { %485 = vmatpush3.msra.mxu0 %v510_v21 }
  0xf7   :  { %487 = vmatmul.mubr.msk.f32.vlgmr.msra.gmra.mxu0 %vm250_vm5, %v45_v22 }
 0x1b7   :  { %v488_v26 = vpop.f32.mrf.mxu0 }
 0x1b8   :  { %v332_v27 = vadd.f32 %v488_v26, %v248_v25 }
 0x1b9   :  { %v326_v29 = vpop.f32.mrf.mxu0 }
 0x1ba   :  { %511 = vtanh.f32 %v332_v27  ;;  %v327_v30 = vadd.f32 %v326_v29, %v243_v28 }
 0x1bc   :  { %513 = vtanh.f32 %v327_v30 }
 0x1c7   :  { %v512_v31 = vpop.eup %511 }
 0x1c8   :  { %489 = vmatprep.subr.msk.mxu1 %vm73_vm3, %v512_v31 }
 0x1c9   :  { %v514_v32 = vpop.eup %513  ;;  %490 = vmatpush3.msk.msra.mxu1 %vm73_vm3, %v512_v31 }
 0x1ca   :  { %491 = vmatprep.subr.mxu1 %v514_v32 }
 0x1cb   :  { %492 = vmatpush3.msra.mxu1 %v514_v32 }
 0x1cc   :  { %494 = vmatmul.mubr.msk.f32.vlgmr.msra.gmra.mxu1 %vm250_vm5, %v48_v33 }
 0x28c   :  { %v495_v34 = vpop.f32.mrf.mxu1 }
 0x28e   :  { %v419_v36 = vpop.f32.mrf.mxu1 }
 0x28f   :  { %v420_v37 = vadd.f32 %v419_v36, %v339_v35 }
 0x291   :  { %427 = vst [vmem:[#allocation7] sm:$0x3] %v420_v37 }
 0x292   :  { %566 = shalt.err (!%p563_p0)
}
 0x293   :  { %437 = dma.vmem_to_hbm [thread:$0]  %s435_s2, 32, %s638_s3, [#allocation4]  }
 0x294   :  { %579 = dma.done.wait [#allocation4], 32  }
 0x295   :  { %580 = vsyncadd [#allocation4], 4294967264 }
 0x296   :  { %441 = vsyncpa [#allocation3], 1 }
 0x297   :  { %442 = vsyncpa [#allocation6], 1 }
 0x298   :  { %443 = vsyncpa [#allocation4], 1 }

</bundles_post_ra>
